<compile_context>
chip_gen: v7x
topology: tpu7x:2x2x1
jax: 0.10.0
libtpu: 0.0.40
codegen_flags: <defaults>
</compile_context>

<pallas_src>
import functools

import jax
import jax.numpy as jnp
from jax import lax
from jax.experimental import pallas as pl
from jax.experimental.pallas import tpu as pltpu

EPS = 1e-5
NEG_SLOPE = 0.2
GROUPS = 4
KSIZE = 3
LANE = 128


def _dcgan_conv_kernel(x_ref, w_ref, b_ref, g_ref, be_ref, o_ref, *, cg, p_real):
    # x_ref : (Nb, Ppad, Kpad) bf16    w_ref : (Kpad, Cpad) bf16
    # b_ref / g_ref / be_ref : (1, Cpad) f32    o_ref : (Nb, Ppad, Cpad) f32
    nb, p_pad, kpad = x_ref.shape
    cpad = w_ref.shape[1]

    # --- Conv as one big MXU matmul (bf16 inputs, f32 accumulate). ---
    # The reshapes only split/merge sublane-aligned leading dims (p_pad % 8 == 0),
    # so they are layout-preserving (no data movement).
    x2 = x_ref[...].reshape(nb * p_pad, kpad)
    conv = jnp.dot(x2, w_ref[...], preferred_element_type=jnp.float32)
    conv = conv.reshape(nb, p_pad, cpad)            # per-sample view (bias NOT added)

    # --- Single-pass GroupNorm statistics (per sample, per channel). ---
    # Spatial-pad rows are exactly zero -> they do not perturb s1/s2.
    s1 = jnp.sum(conv, axis=1)                      # (Nb, Cpad)
    s2 = jnp.sum(conv * conv, axis=1)               # (Nb, Cpad)

    # Fold the conv bias analytically into the tiny row stats:
    #   sum(c+b)   = s1 + P*b
    #   sum((c+b)^2) = s2 + 2*b*s1 + P*b^2
    bias_row = b_ref[...]                           # (1, Cpad)
    pf = float(p_real)
    s2 = s2 + (2.0 * bias_row) * s1 + pf * (bias_row * bias_row)
    s1 = s1 + pf * bias_row

    denom = pf * cg
    ch = lax.broadcasted_iota(jnp.int32, (nb, cpad), 1)
    mean_row = jnp.zeros((nb, cpad), jnp.float32)
    var_row = jnp.zeros((nb, cpad), jnp.float32)
    for g in range(GROUPS):                         # tiny (Nb, Cpad) row math
        m = ((ch >= g * cg) & (ch < (g + 1) * cg)).astype(jnp.float32)
        mu = jnp.sum(s1 * m, axis=1, keepdims=True) / denom        # (Nb, 1)
        ex2 = jnp.sum(s2 * m, axis=1, keepdims=True) / denom
        var = ex2 - mu * mu
        mean_row = mean_row + mu * m
        var_row = var_row + var * m

    # --- Norm + affine (with conv bias folded in) as one FMA, then LeakyReLU. ---
    a_row = g_ref[...] * lax.rsqrt(var_row + EPS)               # (Nb, Cpad)
    b_row = be_ref[...] + (bias_row - mean_row) * a_row         # (Nb, Cpad)
    y = conv * a_row[:, None, :] + b_row[:, None, :]
    y = jnp.maximum(y, NEG_SLOPE * y)               # LeakyReLU(0.2)
    o_ref[...] = y.astype(o_ref.dtype)


def _round_up(v, m):
    return (v + m - 1) // m * m


def _pick_batch_tile(n, p):
    """Largest divisor of n with ~<=1024 matmul rows per step, keeping >=2 grid steps."""
    target = max(1, 1024 // max(p, 1))
    nb = 1
    for d in range(1, n + 1):
        if n % d == 0 and d <= target:
            nb = d
    if n >= 2 and n // nb < 2:                      # keep the batch axis shardable (megacore)
        for d in range(nb - 1, 0, -1):
            if n % d == 0 and n // d >= 2:
                nb = d
                break
    return nb


def _im2col(x_nchw, stride):
    """(N, Cin, H, W) -> (N, P, K) with K-index = cin*9 + kh*3 + kw."""
    n, cin, h, w = x_nchw.shape
    hout = (h + 2 - KSIZE) // stride + 1
    wout = (w + 2 - KSIZE) // stride + 1
    xp = jnp.pad(x_nchw, ((0, 0), (0, 0), (1, 1), (1, 1)))
    slices = []
    for kh in range(KSIZE):
        for kw in range(KSIZE):
            sl = xp[:, :,
                    kh:kh + (hout - 1) * stride + 1:stride,
                    kw:kw + (wout - 1) * stride + 1:stride]        # (N, Cin, Hout, Wout)
            slices.append(sl)
    patches = jnp.stack(slices, axis=2)                            # (N, Cin, 9, Hout, Wout)
    patches = patches.reshape(n, cin * KSIZE * KSIZE, hout, wout)
    patches = patches.transpose(0, 2, 3, 1).reshape(n, hout * wout, cin * KSIZE * KSIZE)
    return patches, hout, wout


@functools.partial(jax.jit, static_argnames=("stride",))
def dcgan_conv_forward(x_nchw, weight, bias, gamma, beta, *, stride):
    """Forward of dcgan_conv. x_nchw: (N, Cin, H, W). Returns (N, Cout, Hout, Wout)."""
    n, cin, _, _ = x_nchw.shape
    cout = weight.shape[0]
    assert cout % GROUPS == 0, "GroupNorm(4) requires Cout divisible by 4"
    cg = cout // GROUPS
    k = cin * KSIZE * KSIZE
    kpad = _round_up(k, LANE)
    cpad = _round_up(cout, LANE)

    patches, hout, wout = _im2col(x_nchw.astype(jnp.bfloat16), stride)
    p = hout * wout
    p_pad = _round_up(p, 8)                                        # sublane alignment
    patches = jnp.pad(patches, ((0, 0), (0, p_pad - p), (0, kpad - k)))  # (N, Ppad, Kpad) bf16

    w_mat = weight.reshape(cout, k).T.astype(jnp.bfloat16)
    w_mat = jnp.pad(w_mat, ((0, kpad - k), (0, cpad - cout)))      # (Kpad, Cpad) bf16
    b2 = jnp.pad(bias.astype(jnp.float32), (0, cpad - cout)).reshape(1, cpad)
    g2 = jnp.pad(gamma.astype(jnp.float32), (0, cpad - cout)).reshape(1, cpad)
    be2 = jnp.pad(beta.astype(jnp.float32), (0, cpad - cout)).reshape(1, cpad)

    nb = _pick_batch_tile(n, p_pad)

    # Double-buffered input blocks + output block, with headroom; raises v5e's
    # 16 MiB default scoped VMEM, stays well inside v7x's 64 MiB physical VMEM.
    block_bytes = (2 * (nb * p_pad * kpad * 2) + 2 * (kpad * cpad * 2)
                   + 2 * (nb * p_pad * cpad * 4) + 6 * cpad * 4)
    vmem_limit = int(min(max(block_bytes * 2, 32 * 1024 * 1024), 96 * 1024 * 1024))

    out = pl.pallas_call(
        functools.partial(_dcgan_conv_kernel, cg=cg, p_real=p),
        out_shape=jax.ShapeDtypeStruct((n, p_pad, cpad), jnp.float32),
        grid_spec=pltpu.PrefetchScalarGridSpec(
            num_scalar_prefetch=0,
            grid=(n // nb,),
            in_specs=[
                pl.BlockSpec((nb, p_pad, kpad), lambda b: (b, 0, 0)),
                pl.BlockSpec((kpad, cpad), lambda b: (0, 0)),
                pl.BlockSpec((1, cpad), lambda b: (0, 0)),
                pl.BlockSpec((1, cpad), lambda b: (0, 0)),
                pl.BlockSpec((1, cpad), lambda b: (0, 0)),
            ],
            out_specs=pl.BlockSpec((nb, p_pad, cpad), lambda b: (b, 0, 0)),
        ),
        compiler_params=pltpu.CompilerParams(
            dimension_semantics=("parallel",),
            vmem_limit_bytes=vmem_limit,
        ),
    )(patches, w_mat, b2, g2, be2)

    out = out[:, :p, :cout].reshape(n, hout, wout, cout).transpose(0, 3, 1, 2)
    return out


def _reference(x_nchw, weight, bias, gamma, beta, stride):
    """Pure-JAX reference matching the PyTorch module."""
    conv = lax.conv_general_dilated(
        x_nchw.astype(jnp.float32), weight.astype(jnp.float32),
        window_strides=(stride, stride), padding=((1, 1), (1, 1)),
        dimension_numbers=("NCHW", "OIHW", "NCHW"))
    conv = conv + bias.reshape(1, -1, 1, 1)
    n, c, h, w = conv.shape
    xg = conv.reshape(n, GROUPS, c // GROUPS, h, w)
    mu = jnp.mean(xg, axis=(2, 3, 4), keepdims=True)
    var = jnp.mean((xg - mu) ** 2, axis=(2, 3, 4), keepdims=True)
    xn = ((xg - mu) * lax.rsqrt(var + EPS)).reshape(n, c, h, w)
    y = xn * gamma.reshape(1, -1, 1, 1) + beta.reshape(1, -1, 1, 1)
    return jnp.where(y >= 0, y, NEG_SLOPE * y)


if __name__ == "__main__":
    key = jax.random.PRNGKey(0)
    k_x, k_w, k_b, k_g, k_beta = jax.random.split(key, 5)

    N, CIN, COUT, H, W = 2, 4, 8, 16, 16   # COUT divisible by 4 (GroupNorm groups)
    STRIDE = 2

    x = jax.random.normal(k_x, (N, CIN, H, W), dtype=jnp.float32)
    weight = jax.random.normal(k_w, (COUT, CIN, KSIZE, KSIZE), dtype=jnp.float32) * 0.1
    bias = jax.random.normal(k_b, (COUT,), dtype=jnp.float32) * 0.1
    gamma = 1.0 + 0.1 * jax.random.normal(k_g, (COUT,), dtype=jnp.float32)
    beta = 0.1 * jax.random.normal(k_beta, (COUT,), dtype=jnp.float32)

    # The kernel feeds the MXU with bf16 activations/weights (f32 accumulate).
    # Quantize the test inputs to bf16-representable values so the f32 reference
    # isolates kernel correctness from the intended quantization.
    xq = x.astype(jnp.bfloat16).astype(jnp.float32)
    wq = weight.astype(jnp.bfloat16).astype(jnp.float32)

    out = dcgan_conv_forward(xq, wq, bias, gamma, beta, stride=STRIDE)
    out = jax.block_until_ready(out)

    ref = _reference(xq, wq, bias, gamma, beta, STRIDE)
    assert out.shape == ref.shape, (out.shape, ref.shape)
    err = float(jnp.max(jnp.abs(out - ref)))
    assert err < 2e-3, err

    print("KERNEL_OK")
</pallas_src>

<mosaic_0001>
module attributes {stable_mosaic.version = 11 : i64} {
  func.func @_dcgan_conv_kernel(%arg0: i32, %arg1: memref<1x64x128xbf16, #tpu.memory_space<vmem>>, %arg2: memref<128x128xbf16, #tpu.memory_space<vmem>>, %arg3: memref<1x128xf32, #tpu.memory_space<vmem>>, %arg4: memref<1x128xf32, #tpu.memory_space<vmem>>, %arg5: memref<1x128xf32, #tpu.memory_space<vmem>>, %arg6: memref<1x64x128xf32, #tpu.memory_space<vmem>>) attributes {dimension_semantics = [#tpu.dimension_semantics<parallel>], iteration_bounds = array<i64: 2>, scalar_prefetch = 0 : i64, scratch_operands = 0 : i64, tpu.core_type = #tpu.core_type<tc>, window_params = [{transform_indices = @transform_0, window_bounds = array<i64: 1, 64, 128>}, {pipeline_mode = #tpu.pipeline_mode<synchronous>, transform_indices = @transform_1, window_bounds = array<i64: 128, 128>}, {pipeline_mode = #tpu.pipeline_mode<synchronous>, transform_indices = @transform_2, window_bounds = array<i64: 1, 128>}, {pipeline_mode = #tpu.pipeline_mode<synchronous>, transform_indices = @transform_3, window_bounds = array<i64: 1, 128>}, {pipeline_mode = #tpu.pipeline_mode<synchronous>, transform_indices = @transform_4, window_bounds = array<i64: 1, 128>}, {transform_indices = @transform_5, window_bounds = array<i64: 1, 64, 128>}]} {
    %c0 = arith.constant 0 : index
    %c0_0 = arith.constant 0 : index
    %c0_1 = arith.constant 0 : index
    %0 = vector.load %arg1[%c0, %c0_0, %c0_1] : memref<1x64x128xbf16, #tpu.memory_space<vmem>>, vector<1x64x128xbf16>
    %1 = vector.shape_cast %0 : vector<1x64x128xbf16> to vector<64x128xbf16>
    %c0_2 = arith.constant 0 : index
    %c0_3 = arith.constant 0 : index
    %2 = vector.load %arg2[%c0_2, %c0_3] : memref<128x128xbf16, #tpu.memory_space<vmem>>, vector<128x128xbf16>
    %cst = arith.constant dense<0.000000e+00> : vector<64x128xf32>
    %3 = tpu.matmul %1, %2, %cst {dimension_numbers = #tpu.dot_dimension_numbers<[1], [0], [0], [1], [0, 0, 1, 1], [], []>} : vector<64x128xbf16>, vector<128x128xbf16>, vector<64x128xf32> -> vector<64x128xf32>
    %4 = vector.shape_cast %3 : vector<64x128xf32> to vector<1x64x128xf32>
    %cst_4 = arith.constant dense<0.000000e+00> : vector<1x128xf32>
    %5 = vector.multi_reduction <add>, %4, %cst_4 [1] : vector<1x64x128xf32> to vector<1x128xf32>
    %6 = arith.mulf %4, %4 : vector<1x64x128xf32>
    %cst_5 = arith.constant dense<0.000000e+00> : vector<1x128xf32>
    %7 = vector.multi_reduction <add>, %6, %cst_5 [1] : vector<1x64x128xf32> to vector<1x128xf32>
    %c0_6 = arith.constant 0 : index
    %c0_7 = arith.constant 0 : index
    %8 = vector.load %arg3[%c0_6, %c0_7] : memref<1x128xf32, #tpu.memory_space<vmem>>, vector<1x128xf32>
    %cst_8 = arith.constant 2.000000e+00 : f32
    %9 = vector.broadcast %cst_8 : f32 to vector<1x128xf32>
    %10 = arith.mulf %9, %8 : vector<1x128xf32>
    %11 = arith.mulf %10, %5 : vector<1x128xf32>
    %12 = arith.addf %7, %11 : vector<1x128xf32>
    %13 = arith.mulf %8, %8 : vector<1x128xf32>
    %cst_9 = arith.constant 6.400000e+01 : f32
    %14 = vector.broadcast %cst_9 : f32 to vector<1x128xf32>
    %15 = arith.mulf %14, %13 : vector<1x128xf32>
    %16 = arith.addf %12, %15 : vector<1x128xf32>
    %cst_10 = arith.constant 6.400000e+01 : f32
    %17 = vector.broadcast %cst_10 : f32 to vector<1x128xf32>
    %18 = arith.mulf %17, %8 : vector<1x128xf32>
    %19 = arith.addf %5, %18 : vector<1x128xf32>
    %20 = tpu.iota {dimensions = array<i32: 1>} : vector<1x128xi32>
    %cst_11 = arith.constant 0.000000e+00 : f32
    %21 = vector.broadcast %cst_11 : f32 to vector<1x128xf32>
    %cst_12 = arith.constant 0.000000e+00 : f32
    %22 = vector.broadcast %cst_12 : f32 to vector<1x128xf32>
    %c0_i32 = arith.constant 0 : i32
    %23 = vector.broadcast %c0_i32 : i32 to vector<1x128xi32>
    %24 = arith.cmpi sge, %20, %23 : vector<1x128xi32>
    %c2_i32 = arith.constant 2 : i32
    %25 = vector.broadcast %c2_i32 : i32 to vector<1x128xi32>
    %26 = arith.cmpi slt, %20, %25 : vector<1x128xi32>
    %27 = arith.andi %24, %26 : vector<1x128xi1>
    %28 = arith.extui %27 : vector<1x128xi1> to vector<1x128xi32>
    %29 = arith.sitofp %28 : vector<1x128xi32> to vector<1x128xf32>
    %30 = arith.mulf %19, %29 : vector<1x128xf32>
    %cst_13 = arith.constant dense<0.000000e+00> : vector<1xf32>
    %31 = vector.multi_reduction <add>, %30, %cst_13 [1] : vector<1x128xf32> to vector<1xf32>
    %32 = vector.shape_cast %31 : vector<1xf32> to vector<1x1xf32>
    %cst_14 = arith.constant 1.280000e+02 : f32
    %33 = vector.broadcast %cst_14 : f32 to vector<1x1xf32>
    %34 = arith.divf %32, %33 : vector<1x1xf32>
    %35 = arith.mulf %16, %29 : vector<1x128xf32>
    %cst_15 = arith.constant dense<0.000000e+00> : vector<1xf32>
    %36 = vector.multi_reduction <add>, %35, %cst_15 [1] : vector<1x128xf32> to vector<1xf32>
    %37 = vector.shape_cast %36 : vector<1xf32> to vector<1x1xf32>
    %cst_16 = arith.constant 1.280000e+02 : f32
    %38 = vector.broadcast %cst_16 : f32 to vector<1x1xf32>
    %39 = arith.divf %37, %38 : vector<1x1xf32>
    %40 = arith.mulf %34, %34 : vector<1x1xf32>
    %41 = arith.subf %39, %40 : vector<1x1xf32>
    %42 = vector.broadcast %34 : vector<1x1xf32> to vector<1x128xf32>
    %43 = arith.mulf %42, %29 : vector<1x128xf32>
    %44 = arith.addf %21, %43 : vector<1x128xf32>
    %45 = vector.broadcast %41 : vector<1x1xf32> to vector<1x128xf32>
    %46 = arith.mulf %45, %29 : vector<1x128xf32>
    %47 = arith.addf %22, %46 : vector<1x128xf32>
    %c2_i32_17 = arith.constant 2 : i32
    %48 = vector.broadcast %c2_i32_17 : i32 to vector<1x128xi32>
    %49 = arith.cmpi sge, %20, %48 : vector<1x128xi32>
    %c4_i32 = arith.constant 4 : i32
    %50 = vector.broadcast %c4_i32 : i32 to vector<1x128xi32>
    %51 = arith.cmpi slt, %20, %50 : vector<1x128xi32>
    %52 = arith.andi %49, %51 : vector<1x128xi1>
    %53 = arith.extui %52 : vector<1x128xi1> to vector<1x128xi32>
    %54 = arith.sitofp %53 : vector<1x128xi32> to vector<1x128xf32>
    %55 = arith.mulf %19, %54 : vector<1x128xf32>
    %cst_18 = arith.constant dense<0.000000e+00> : vector<1xf32>
    %56 = vector.multi_reduction <add>, %55, %cst_18 [1] : vector<1x128xf32> to vector<1xf32>
    %57 = vector.shape_cast %56 : vector<1xf32> to vector<1x1xf32>
    %cst_19 = arith.constant 1.280000e+02 : f32
    %58 = vector.broadcast %cst_19 : f32 to vector<1x1xf32>
    %59 = arith.divf %57, %58 : vector<1x1xf32>
    %60 = arith.mulf %16, %54 : vector<1x128xf32>
    %cst_20 = arith.constant dense<0.000000e+00> : vector<1xf32>
    %61 = vector.multi_reduction <add>, %60, %cst_20 [1] : vector<1x128xf32> to vector<1xf32>
    %62 = vector.shape_cast %61 : vector<1xf32> to vector<1x1xf32>
    %cst_21 = arith.constant 1.280000e+02 : f32
    %63 = vector.broadcast %cst_21 : f32 to vector<1x1xf32>
    %64 = arith.divf %62, %63 : vector<1x1xf32>
    %65 = arith.mulf %59, %59 : vector<1x1xf32>
    %66 = arith.subf %64, %65 : vector<1x1xf32>
    %67 = vector.broadcast %59 : vector<1x1xf32> to vector<1x128xf32>
    %68 = arith.mulf %67, %54 : vector<1x128xf32>
    %69 = arith.addf %44, %68 : vector<1x128xf32>
    %70 = vector.broadcast %66 : vector<1x1xf32> to vector<1x128xf32>
    %71 = arith.mulf %70, %54 : vector<1x128xf32>
    %72 = arith.addf %47, %71 : vector<1x128xf32>
    %c4_i32_22 = arith.constant 4 : i32
    %73 = vector.broadcast %c4_i32_22 : i32 to vector<1x128xi32>
    %74 = arith.cmpi sge, %20, %73 : vector<1x128xi32>
    %c6_i32 = arith.constant 6 : i32
    %75 = vector.broadcast %c6_i32 : i32 to vector<1x128xi32>
    %76 = arith.cmpi slt, %20, %75 : vector<1x128xi32>
    %77 = arith.andi %74, %76 : vector<1x128xi1>
    %78 = arith.extui %77 : vector<1x128xi1> to vector<1x128xi32>
    %79 = arith.sitofp %78 : vector<1x128xi32> to vector<1x128xf32>
    %80 = arith.mulf %19, %79 : vector<1x128xf32>
    %cst_23 = arith.constant dense<0.000000e+00> : vector<1xf32>
    %81 = vector.multi_reduction <add>, %80, %cst_23 [1] : vector<1x128xf32> to vector<1xf32>
    %82 = vector.shape_cast %81 : vector<1xf32> to vector<1x1xf32>
    %cst_24 = arith.constant 1.280000e+02 : f32
    %83 = vector.broadcast %cst_24 : f32 to vector<1x1xf32>
    %84 = arith.divf %82, %83 : vector<1x1xf32>
    %85 = arith.mulf %16, %79 : vector<1x128xf32>
    %cst_25 = arith.constant dense<0.000000e+00> : vector<1xf32>
    %86 = vector.multi_reduction <add>, %85, %cst_25 [1] : vector<1x128xf32> to vector<1xf32>
    %87 = vector.shape_cast %86 : vector<1xf32> to vector<1x1xf32>
    %cst_26 = arith.constant 1.280000e+02 : f32
    %88 = vector.broadcast %cst_26 : f32 to vector<1x1xf32>
    %89 = arith.divf %87, %88 : vector<1x1xf32>
    %90 = arith.mulf %84, %84 : vector<1x1xf32>
    %91 = arith.subf %89, %90 : vector<1x1xf32>
    %92 = vector.broadcast %84 : vector<1x1xf32> to vector<1x128xf32>
    %93 = arith.mulf %92, %79 : vector<1x128xf32>
    %94 = arith.addf %69, %93 : vector<1x128xf32>
    %95 = vector.broadcast %91 : vector<1x1xf32> to vector<1x128xf32>
    %96 = arith.mulf %95, %79 : vector<1x128xf32>
    %97 = arith.addf %72, %96 : vector<1x128xf32>
    %c6_i32_27 = arith.constant 6 : i32
    %98 = vector.broadcast %c6_i32_27 : i32 to vector<1x128xi32>
    %99 = arith.cmpi sge, %20, %98 : vector<1x128xi32>
    %c8_i32 = arith.constant 8 : i32
    %100 = vector.broadcast %c8_i32 : i32 to vector<1x128xi32>
    %101 = arith.cmpi slt, %20, %100 : vector<1x128xi32>
    %102 = arith.andi %99, %101 : vector<1x128xi1>
    %103 = arith.extui %102 : vector<1x128xi1> to vector<1x128xi32>
    %104 = arith.sitofp %103 : vector<1x128xi32> to vector<1x128xf32>
    %105 = arith.mulf %19, %104 : vector<1x128xf32>
    %cst_28 = arith.constant dense<0.000000e+00> : vector<1xf32>
    %106 = vector.multi_reduction <add>, %105, %cst_28 [1] : vector<1x128xf32> to vector<1xf32>
    %107 = vector.shape_cast %106 : vector<1xf32> to vector<1x1xf32>
    %cst_29 = arith.constant 1.280000e+02 : f32
    %108 = vector.broadcast %cst_29 : f32 to vector<1x1xf32>
    %109 = arith.divf %107, %108 : vector<1x1xf32>
    %110 = arith.mulf %16, %104 : vector<1x128xf32>
    %cst_30 = arith.constant dense<0.000000e+00> : vector<1xf32>
    %111 = vector.multi_reduction <add>, %110, %cst_30 [1] : vector<1x128xf32> to vector<1xf32>
    %112 = vector.shape_cast %111 : vector<1xf32> to vector<1x1xf32>
    %cst_31 = arith.constant 1.280000e+02 : f32
    %113 = vector.broadcast %cst_31 : f32 to vector<1x1xf32>
    %114 = arith.divf %112, %113 : vector<1x1xf32>
    %115 = arith.mulf %109, %109 : vector<1x1xf32>
    %116 = arith.subf %114, %115 : vector<1x1xf32>
    %117 = vector.broadcast %109 : vector<1x1xf32> to vector<1x128xf32>
    %118 = arith.mulf %117, %104 : vector<1x128xf32>
    %119 = arith.addf %94, %118 : vector<1x128xf32>
    %120 = vector.broadcast %116 : vector<1x1xf32> to vector<1x128xf32>
    %121 = arith.mulf %120, %104 : vector<1x128xf32>
    %122 = arith.addf %97, %121 : vector<1x128xf32>
    %c0_32 = arith.constant 0 : index
    %c0_33 = arith.constant 0 : index
    %123 = vector.load %arg4[%c0_32, %c0_33] : memref<1x128xf32, #tpu.memory_space<vmem>>, vector<1x128xf32>
    %cst_34 = arith.constant 9.99999974E-6 : f32
    %124 = vector.broadcast %cst_34 : f32 to vector<1x128xf32>
    %125 = arith.addf %122, %124 : vector<1x128xf32>
    %126 = math.rsqrt %125 : vector<1x128xf32>
    %127 = arith.mulf %123, %126 : vector<1x128xf32>
    %c0_35 = arith.constant 0 : index
    %c0_36 = arith.constant 0 : index
    %128 = vector.load %arg5[%c0_35, %c0_36] : memref<1x128xf32, #tpu.memory_space<vmem>>, vector<1x128xf32>
    %129 = arith.subf %8, %119 : vector<1x128xf32>
    %130 = arith.mulf %129, %127 : vector<1x128xf32>
    %131 = arith.addf %128, %130 : vector<1x128xf32>
    %132 = vector.shape_cast %127 : vector<1x128xf32> to vector<1x1x128xf32>
    %133 = vector.broadcast %132 : vector<1x1x128xf32> to vector<1x64x128xf32>
    %134 = arith.mulf %4, %133 : vector<1x64x128xf32>
    %135 = vector.shape_cast %131 : vector<1x128xf32> to vector<1x1x128xf32>
    %136 = vector.broadcast %135 : vector<1x1x128xf32> to vector<1x64x128xf32>
    %137 = arith.addf %134, %136 : vector<1x64x128xf32>
    %cst_37 = arith.constant 2.000000e-01 : f32
    %138 = vector.broadcast %cst_37 : f32 to vector<1x64x128xf32>
    %139 = arith.mulf %138, %137 : vector<1x64x128xf32>
    %140 = arith.maximumf %137, %139 : vector<1x64x128xf32>
    %c0_38 = arith.constant 0 : index
    %c0_39 = arith.constant 0 : index
    %c0_40 = arith.constant 0 : index
    %141 = vector.load %arg6[%c0_38, %c0_39, %c0_40] : memref<1x64x128xf32, #tpu.memory_space<vmem>>, vector<1x64x128xf32>
    tpu.vector_store %arg6[%c0_38, %c0_39, %c0_40], %140 {strides = array<i32>} : memref<1x64x128xf32, #tpu.memory_space<vmem>>, vector<1x64x128xf32>,
    return
  }
  func.func @transform_0(%arg0: i32) -> (i32, i32, i32) {
    %c0_i32 = arith.constant 0 : i32
    %c0_i32_0 = arith.constant 0 : i32
    %c0_i32_1 = arith.constant 0 : i32
    return %arg0, %c0_i32, %c0_i32_0 : i32, i32, i32
  }
  func.func @transform_1(%arg0: i32) -> (i32, i32) {
    %c0_i32 = arith.constant 0 : i32
    %c0_i32_0 = arith.constant 0 : i32
    %c0_i32_1 = arith.constant 0 : i32
    return %c0_i32, %c0_i32_0 : i32, i32
  }
  func.func @transform_2(%arg0: i32) -> (i32, i32) {
    %c0_i32 = arith.constant 0 : i32
    %c0_i32_0 = arith.constant 0 : i32
    %c0_i32_1 = arith.constant 0 : i32
    return %c0_i32, %c0_i32_0 : i32, i32
  }
  func.func @transform_3(%arg0: i32) -> (i32, i32) {
    %c0_i32 = arith.constant 0 : i32
    %c0_i32_0 = arith.constant 0 : i32
    %c0_i32_1 = arith.constant 0 : i32
    return %c0_i32, %c0_i32_0 : i32, i32
  }
  func.func @transform_4(%arg0: i32) -> (i32, i32) {
    %c0_i32 = arith.constant 0 : i32
    %c0_i32_0 = arith.constant 0 : i32
    %c0_i32_1 = arith.constant 0 : i32
    return %c0_i32, %c0_i32_0 : i32, i32
  }
  func.func @transform_5(%arg0: i32) -> (i32, i32, i32) {
    %c0_i32 = arith.constant 0 : i32
    %c0_i32_0 = arith.constant 0 : i32
    %c0_i32_1 = arith.constant 0 : i32
    return %arg0, %c0_i32, %c0_i32_0 : i32, i32, i32
  }
}

</mosaic_0001>

<bundles_post_ra>
// kernel: dcgan_conv_forward.1
= control target key start
LH: loop header
LB: loop body
LE: loop exit
PB: predicated region body
PF: predicated region fallthrough
CT: control target
= control target key end

     0   :  { %s776_s18 = smov 0   ;;  %s913_s0 = inlined_call_operand.vmem [shape: bf16[2,64,128], index: 0, kind: input, shape index: {}]   ;;  %s914_s1 = inlined_call_operand.vmem [shape: bf16[128,128], index: 1, kind: input, shape index: {}]   ;;  %s915_s2 = inlined_call_operand.vmem [shape: f32[1,128], index: 2, kind: input, shape index: {}]   ;;  %s916_s3 = inlined_call_operand.vmem [shape: f32[1,128], index: 3, kind: input, shape index: {}]   ;;  %s917_s4 = inlined_call_operand.vmem [shape: f32[1,128], index: 4, kind: input, shape index: {}]   ;;  %s918_s5 = inlined_call_operand.vmem [shape: f32[2,64,128], index: 5, kind: output, shape index: {}]  }
   0x1 LB: > { %s633_s19 = sadd.s32 4294967295, %s743_s18   ;;  %p637_p0 = scmp.ge.s32.totalorder %s743_s18, 1  ;;  %s743_s18 = sphi %s776_s18, %s15_s18  }
   0x2   : > { %p187_p1 = scmp.lt.s32.totalorder %s743_s18, 3 }
   0x4   : > { %p188_p2 = pnand %p637_p0, %p187_p1 }
   0x5   : > { %v723_v0 = vld [vmem:[%s914_s1] sm:$0xff] (!%p188_p2)   ;;  %p215_p3 = scmp.lt.s32.totalorder (!%p188_p2), %s633_s19, 1  ;;  %v724_v1 = vld [vmem:[%s914_s1 + $0x8] sm:$0xff] (!%p188_p2)   ;;  %v725_v2 = vld [vmem:[%s914_s1 + $0x10] sm:$0xff] (!%p188_p2)   ;;  %v430_v41 = vlaneseq (!%p188_p2)  ;;  %v745_v59 = vmov (!%p188_p2), 0.0   ;;  %vm438_vm6 = vcmask (!%p188_p2), 1040384  }
   0x6   : > { %191 = sbr.rel (%p188_p2) target bundleno = 481 (0x1e1), region = 40  ;;  %674 = vmatprep.subr.bf16.mxu0 (!%p188_p2), %v723_v0  ;;  %698 = vmatprep.subr.bf16.mxu1 (!%p188_p2), %v723_v0  ;;  %v726_v3 = vld [vmem:[%s914_s1 + $0x18] sm:$0xff] (!%p188_p2)   ;;  %v727_v6 = vld [vmem:[%s914_s1 + $0x20] sm:$0xff] (!%p188_p2)   ;;  %v728_v7 = vld [vmem:[%s914_s1 + $0x28] sm:$0xff] (!%p188_p2)  }
   0x7   : > { %675 = vmatpush3.bf16.msra.mxu0 (!%p188_p2), %v723_v0  ;;  %706 = vmatpush3.bf16.msra.mxu1 (!%p188_p2), %v723_v0  ;;  %v729_v8 = vld [vmem:[%s914_s1 + $0x30] sm:$0xff] (!%p188_p2)   ;;  %v730_v9 = vld [vmem:[%s914_s1 + $0x38] sm:$0xff] (!%p188_p2)   ;;  %v863_v46 = vld [vmem:[%s915_s2] sm:$0x1] (!%p188_p2)  ;;  %v431_v47 = vand.u32 (!%p188_p2), 127, %v430_v41 }
   0x8   : > { %676 = vmatprep.subr.bf16.mxu0 (!%p188_p2), %v724_v1  ;;  %699 = vmatprep.subr.bf16.mxu1 (!%p188_p2), %v724_v1  ;;  %v428_v52 = vmul.f32 (!%p188_p2), 64.0, %v863_v46  ;;  %v422_v53 = vmul.f32 (!%p188_p2), 2.0, %v863_v46  ;;  %v425_v56 = vmul.f32 (!%p188_p2), %v863_v46, %v863_v46 }
   0x9   : > { %vm433_vm0 = vcmp.lt.s32.totalorder (!%p188_p2), %v431_v47, 2  ;;  %vm455_vm1 = vcmp.ge.s32.totalorder (!%p188_p2), %v431_v47, 2  ;;  %vm456_vm2 = vcmp.lt.s32.totalorder (!%p188_p2), %v431_v47, 4  ;;  %vm476_vm4 = vcmp.ge.s32.totalorder (!%p188_p2), %v431_v47, 4 }
   0xa   : > { %vm457_vm3 = vmand (!%p188_p2), %vm455_vm1, %vm456_vm2  ;;  %v870_v60 = vsel (!%p188_p2), %vm433_vm0, 1.0, %v745_v59  ;;  %vm477_vm5 = vcmp.lt.s32.totalorder (!%p188_p2), %v431_v47, 6  ;;  %v426_v0 = vmul.f32 (!%p188_p2), 64.0, %v425_v56  ;;  %vm497_vm8 = vcmp.ge.s32.totalorder (!%p188_p2), %v431_v47, 6 }
   0xb   : > { %677 = vmatpush3.bf16.msra.mxu0 (!%p188_p2), %v724_v1  ;;  %707 = vmatpush3.bf16.msra.mxu1 (!%p188_p2), %v724_v1  ;;  %v872_v1 = vsel (!%p188_p2), %vm457_vm3, 1.0, %v745_v59  ;;  %vm478_vm7 = vmand (!%p188_p2), %vm476_vm4, %vm477_vm5  ;;  %vm498_vm9 = vcmp.lt.s32.totalorder (!%p188_p2), %v431_v47, 8 }
   0xc   : > { %678 = vmatprep.subr.bf16.mxu0 (!%p188_p2), %v725_v2  ;;  %700 = vmatprep.subr.bf16.mxu1 (!%p188_p2), %v725_v2  ;;  %vm499_vm10 = vmand (!%p188_p2), %vm497_vm8, %vm498_vm9 }
   0xd   : > { %s920_s19 = smov (!%p215_p3, %s633_s19), 1 }
   0xe   : > { %s660_s26 = sshll.u32 %s920_s19, 5  ;;  %s661_s23 = sshll.u32 %s920_s19, 6 }
   0xf   : > { %s799_s29 = scalar_lea.vmem %s913_s0, %s660_s26  ;;  %679 = vmatpush3.bf16.msra.mxu0 %v725_v2  ;;  %708 = vmatpush3.bf16.msra.mxu1 %v725_v2  ;;  %s224_s26 = scalar_lea.vmem %s918_s5, %s661_s23 }
  0x10   : > { %v731_v4 = vld [vmem:[%s799_s29] sm:$0xff]   ;;  %v733_v5 = vld [vmem:[%s799_s29 + $0x10] sm:$0xff]   ;;  %680 = vmatprep.subr.bf16.mxu0 %v726_v3  ;;  %701 = vmatprep.subr.bf16.mxu1 %v726_v3  ;;  %v732_v10 = vld [vmem:[%s799_s29 + $0x8] sm:$0xff]  }
  0x11   : > { %690 = vmatprep.mubr.bf16.mxu0 %v731_v4  ;;  %694 = vmatprep.mubr.bf16.mxu1 %v733_v5  ;;  %v734_v11 = vld [vmem:[%s799_s29 + $0x18] sm:$0xff]  }
  0x13   : > { %681 = vmatpush3.bf16.msra.mxu0 %v726_v3  ;;  %709 = vmatpush3.bf16.msra.mxu1 %v726_v3 }
  0x14   : > { %682 = vmatprep.subr.bf16.mxu0 %v727_v6  ;;  %702 = vmatprep.subr.bf16.mxu1 %v727_v6 }
  0x17   : > { %683 = vmatpush3.bf16.msra.mxu0 %v727_v6  ;;  %710 = vmatpush3.bf16.msra.mxu1 %v727_v6 }
  0x18   : > { %684 = vmatprep.subr.bf16.mxu0 %v728_v7  ;;  %703 = vmatprep.subr.bf16.mxu1 %v728_v7 }
  0x1b   : > { %685 = vmatpush3.bf16.msra.mxu0 %v728_v7  ;;  %711 = vmatpush3.bf16.msra.mxu1 %v728_v7  ;;  %v656_v7 = vsel %vm478_vm7, 1.0, %v745_v59 }
  0x1c   : > { %686 = vmatprep.subr.bf16.mxu0 %v729_v8  ;;  %704 = vmatprep.subr.bf16.mxu1 %v729_v8 }
  0x1f   : > { %687 = vmatpush3.bf16.msra.mxu0 %v729_v8  ;;  %712 = vmatpush3.bf16.msra.mxu1 %v729_v8 }
  0x20   : > { %688 = vmatprep.subr.bf16.mxu0 %v730_v9  ;;  %705 = vmatprep.subr.bf16.mxu1 %v730_v9 }
  0x23   : > { %689 = vmatpush3.bf16.msra.mxu0 %v730_v9  ;;  %713 = vmatpush3.bf16.msra.mxu1 %v730_v9 }
  0x26   : > { %691 = vmatmul.mubr.bf16.vlgmr.msra.gmra.mrb[0].mxu0 %v732_v10  ;;  %695 = vmatmul.mubr.bf16.vlgmr.msra.gmra.mrb[0].mxu1 %v734_v11 }
  0xf9   : > { %v820_v12 = vpop.f32.mrb[0].mxu0  ;;  %v822_v13 = vpop.f32.mrb[0].mxu1 }
  0xfa   : > { %v824_v14 = vpop.f32.mrb[1].mxu0  ;;  %v826_v15 = vpop.f32.mrb[1].mxu1  ;;  %v402_v23 = vmul.f32 %v820_v12, %v820_v12  ;;  %v406_v35 = vmul.f32 %v822_v13, %v822_v13 }
  0xfb   : > { %v828_v16 = vpop.f32.mrb[2].mxu0  ;;  %v830_v17 = vpop.f32.mrb[2].mxu1  ;;  %v400_v20 = vmul.f32 %v824_v14, %v824_v14  ;;  %v404_v29 = vmul.f32 %v826_v15, %v826_v15 }
  0xfc   : > { %v832_v18 = vpop.f32.mrb[3].mxu0  ;;  %v834_v19 = vpop.f32.mrb[3].mxu1  ;;  %v403_v26 = vmul.f32 %v828_v16, %v828_v16  ;;  %v407_v38 = vmul.f32 %v830_v17, %v830_v17 }
  0xfd   : > { %v387_v21 = vadd.f32 %v832_v18, %v824_v14  ;;  %v401_v22 = vmul.f32 %v832_v18, %v832_v18  ;;  %v405_v34 = vmul.f32 %v834_v19, %v834_v19 }
  0xff   : > { %v388_v24 = vadd.f32 %v820_v12, %v387_v21  ;;  %v408_v25 = vadd.f32 %v401_v22, %v400_v20  ;;  %v657_v21 = vsel %vm499_vm10, 1.0, %v745_v59 }
 0x101   : > { %v409_v27 = vadd.f32 %v408_v25, %v402_v23  ;;  %v389_v28 = vadd.f32 %v828_v16, %v388_v24 }
 0x103   : > { %v390_v30 = vadd.f32 %v389_v28, %v826_v15  ;;  %v410_v31 = vadd.f32 %v409_v27, %v403_v26 }
 0x105   : > { %v411_v32 = vadd.f32 %v410_v31, %v404_v29  ;;  %v391_v33 = vadd.f32 %v390_v30, %v834_v19 }
 0x107   : > { %v392_v36 = vadd.f32 %v822_v13, %v391_v33  ;;  %v412_v37 = vadd.f32 %v411_v32, %v405_v34 }
 0x109   : > { %v393_v39 = vadd.f32 %v830_v17, %v392_v36  ;;  %v413_v40 = vadd.f32 %v412_v37, %v406_v35 }
 0x10b   : > { %v394_v42 = vrot.slane %v393_v39, 4  ;;  %v414_v43 = vadd.f32 %v413_v40, %v407_v38 }
 0x10d   : > { %v395_v44 = vadd.f32 %v394_v42, %v393_v39  ;;  %v415_v45 = vrot.slane %v414_v43, 4 }
 0x10f   : > { %v396_v48 = vrot.slane %v395_v44, 2  ;;  %v416_v49 = vadd.f32 %v415_v45, %v414_v43 }
 0x111   : > { %v397_v50 = vadd.f32 %v396_v48, %v395_v44  ;;  %v417_v51 = vrot.slane %v416_v49, 2 }
 0x113   : > { %v398_v54 = vrot.slane %v397_v50, 1  ;;  %v418_v55 = vadd.f32 %v417_v51, %v416_v49 }
 0x115   : > { %v419_v57 = vrot.slane %v418_v55, 1  ;;  %v399_v58 = vadd.f32 %v398_v54, %v397_v50 }
 0x117   : > { %v429_v61 = vadd.f32 %v428_v52, %v399_v58  ;;  %v420_v62 = vadd.f32 %v419_v57, %v418_v55  ;;  %v423_v63 = vmul.f32 %v422_v53, %v399_v58 }
 0x119   : > { %v437_v2 = vmul.f32 %v870_v60, %v429_v61  ;;  %v424_v3 = vadd.f32 %v423_v63, %v420_v62  ;;  %v460_v5 = vmul.f32 %v872_v1, %v429_v61  ;;  %v481_v11 = vmul.f32 %v656_v7, %v429_v61 }
 0x11a   : > { %v502_v24 = vmul.f32 %v657_v21, %v429_v61 }
 0x11b   : > { %v439_v4 = vsel %vm438_vm6, %v437_v2, 0.0  ;;  %v427_v6 = vadd.f32 %v426_v0, %v424_v3  ;;  %v461_v9 = vsel %vm438_vm6, %v460_v5, 0.0  ;;  %v482_v22 = vsel %vm438_vm6, %v481_v11, 0.0  ;;  %v518_v11 = vld [vmem:[%s916_s3] sm:$0x1] }
 0x11c   : > { %440 = vadd.xlane.f32.xlu0 %v439_v4  ;;  %v503_v26 = vsel %vm438_vm6, %v502_v24, 0.0 }
 0x11d   : > { %v444_v8 = vmul.f32 %v870_v60, %v427_v6  ;;  %v465_v20 = vmul.f32 %v872_v1, %v427_v6  ;;  %v486_v25 = vmul.f32 %v656_v7, %v427_v6  ;;  %v507_v28 = vmul.f32 %v657_v21, %v427_v6 }
 0x11f   : > { %v445_v10 = vsel %vm438_vm6, %v444_v8, 0.0  ;;  %v466_v23 = vsel %vm438_vm6, %v465_v20, 0.0  ;;  %v487_v27 = vsel %vm438_vm6, %v486_v25, 0.0  ;;  %v508_v29 = vsel %vm438_vm6, %v507_v28, 0.0 }
 0x120   : > { %462 = vadd.xlane.f32.xlu0 %v461_v9  ;;  %446 = vadd.xlane.f32.xlu1 %v445_v10  ;;  %v528_v9 = vshrl.u32 %v430_v41, 7 }
 0x122   : > { %v529_v20 = vsub.s32 0, %v528_v9 }
 0x124   : > { %483 = vadd.xlane.f32.xlu0 %v482_v22  ;;  %467 = vadd.xlane.f32.xlu1 %v466_v23 }
 0x128   : > { %504 = vadd.xlane.f32.xlu0 %v503_v26  ;;  %488 = vadd.xlane.f32.xlu1 %v487_v27 }
 0x12c   : > { %509 = vadd.xlane.f32.xlu1 %v508_v29 }
 0x1a9   : > { %v441_v30 = vpop.xlane.xlu0 %440 }
 0x1aa   : > { %v443_v34 = vmul.f32 0.0078125, %v441_v30 }
 0x1ac   : > { %v449_v42 = vmul.f32 %v443_v34, %v443_v34  ;;  %v451_v3 = vmul.f32 %v870_v60, %v443_v34 }
 0x1ad   : > { %v463_v31 = vpop.xlane.xlu0 %462  ;;  %v447_v32 = vpop.xlane.xlu1 %446 }
 0x1ae   : > { %v464_v33 = vmul.f32 0.0078125, %v463_v31  ;;  %v448_v38 = vmul.f32 0.0078125, %v447_v32 }
 0x1b0   : > { %v470_v37 = vmul.f32 %v464_v33, %v464_v33  ;;  %v450_v47 = vsub.f32 %v448_v38, %v449_v42  ;;  %v472_v2 = vmul.f32 %v872_v1, %v464_v33 }
 0x1b1   : > { %v484_v35 = vpop.xlane.xlu0 %483  ;;  %v468_v36 = vpop.xlane.xlu1 %467 }
 0x1b2   : > { %v485_v39 = vmul.f32 0.0078125, %v484_v35  ;;  %v469_v40 = vmul.f32 0.0078125, %v468_v36  ;;  %v453_v54 = vmul.f32 %v870_v60, %v450_v47  ;;  %v473_v5 = vadd.f32 %v472_v2, %v451_v3  ;;  %v522_v60 = vld [vmem:[%s917_s4] sm:$0x1] }
 0x1b4   : > { %v471_v43 = vsub.f32 %v469_v40, %v470_v37  ;;  %v491_v48 = vmul.f32 %v485_v39, %v485_v39  ;;  %v493_v4 = vmul.f32 %v656_v7, %v485_v39 }
 0x1b5   : > { %v505_v44 = vpop.xlane.xlu0 %504  ;;  %v489_v45 = vpop.xlane.xlu1 %488 }
 0x1b6   : > { %v506_v49 = vmul.f32 0.0078125, %v505_v44  ;;  %v490_v50 = vmul.f32 0.0078125, %v489_v45  ;;  %v474_v51 = vmul.f32 %v872_v1, %v471_v43  ;;  %v494_v8 = vadd.f32 %v493_v4, %v473_v5 }
 0x1b8   : > { %v492_v52 = vsub.f32 %v490_v50, %v491_v48  ;;  %v512_v55 = vmul.f32 %v506_v49, %v506_v49  ;;  %v475_v58 = vadd.f32 %v474_v51, %v453_v54  ;;  %v514_v6 = vmul.f32 %v657_v21, %v506_v49 }
 0x1b9   : > { %v510_v53 = vpop.xlane.xlu1 %509 }
 0x1ba   : > { %v495_v56 = vmul.f32 %v656_v7, %v492_v52  ;;  %v511_v57 = vmul.f32 0.0078125, %v510_v53  ;;  %v515_v10 = vadd.f32 %v514_v6, %v494_v8 }
 0x1bc   : > { %v513_v59 = vsub.f32 %v511_v57, %v512_v55  ;;  %v496_v61 = vadd.f32 %v495_v56, %v475_v58  ;;  %v523_v23 = vsub.f32 %v863_v46, %v515_v10 }
 0x1be   : > { %v516_v62 = vmul.f32 %v657_v21, %v513_v59 }
 0x1c0   : > { %v517_v63 = vadd.f32 %v516_v62, %v496_v61 }
 0x1c2   : > { %v519_v0 = vadd.f32 1e-05, %v517_v63 }
 0x1c4   : > { %735 = vrsqrt.f32 %v519_v0 }
 0x1ce   : > { %v736_v22 = vpop.eup %735 }
 0x1cf   : > { %v521_v1 = vmul.f32 %v736_v22, %v518_v11 }
 0x1d1   : > { %v524_v7 = vmul.f32 %v523_v23, %v521_v1  ;;  %v530_v21 = vrot.slane %v521_v1, %v529_v20 }
 0x1d3   : > { %v525_v24 = vadd.f32 %v524_v7, %v522_v60  ;;  %v532_v41 = vmul.f32 %v530_v21, %v824_v14  ;;  %v533_v25 = vmul.f32 %v530_v21, %v832_v18  ;;  %v534_v26 = vmul.f32 %v820_v12, %v530_v21 }
 0x1d4   : > { %v535_v27 = vmul.f32 %v828_v16, %v530_v21  ;;  %v536_v29 = vmul.f32 %v530_v21, %v826_v15  ;;  %v537_v46 = vmul.f32 %v530_v21, %v834_v19  ;;  %v538_v30 = vmul.f32 %v822_v13, %v530_v21 }
 0x1d5   : > { %v544_v28 = vrot.slane %v525_v24, %v529_v20  ;;  %v539_v31 = vmul.f32 %v830_v17, %v530_v21 }
 0x1d7   : > { %v546_v32 = vadd.f32 %v544_v28, %v532_v41  ;;  %v547_v33 = vadd.f32 %v544_v28, %v533_v25  ;;  %v548_v34 = vadd.f32 %v544_v28, %v534_v26  ;;  %v549_v14 = vadd.f32 %v544_v28, %v535_v27 }
 0x1d8   : > { %v550_v35 = vadd.f32 %v544_v28, %v536_v29  ;;  %v551_v18 = vadd.f32 %v544_v28, %v537_v46  ;;  %v552_v36 = vadd.f32 %v544_v28, %v538_v30  ;;  %v553_v12 = vadd.f32 %v544_v28, %v539_v31 }
 0x1d9   : > { %v554_v37 = vmul.f32 0.2, %v546_v32  ;;  %v555_v16 = vmul.f32 0.2, %v547_v33  ;;  %v556_v38 = vmul.f32 0.2, %v548_v34 }
 0x1da   : > { %v557_v15 = vmul.f32 0.2, %v549_v14  ;;  %v558_v13 = vmul.f32 0.2, %v550_v35  ;;  %v559_v19 = vmul.f32 0.2, %v551_v18 }
 0x1db   : > { %v560_v17 = vmul.f32 0.2, %v552_v36  ;;  %v561_v39 = vmul.f32 0.2, %v553_v12  ;;  %v562_v40 = vmax.f32 %v546_v32, %v554_v37  ;;  %v563_v42 = vmax.f32 %v547_v33, %v555_v16 }
 0x1dc   : > { %v564_v43 = vmax.f32 %v548_v34, %v556_v38  ;;  %v565_v44 = vmax.f32 %v549_v14, %v557_v15  ;;  %v566_v45 = vmax.f32 %v550_v35, %v558_v13  ;;  %v567_v47 = vmax.f32 %v551_v18, %v559_v19 }
 0x1dd   : > { %v568_v48 = vmax.f32 %v552_v36, %v560_v17  ;;  %v569_v49 = vmax.f32 %v553_v12, %v561_v39  ;;  %570 = vst [vmem:[%s224_s26] sm:$0xff] %v562_v40  ;;  %571 = vst [vmem:[%s224_s26 + $0x8] sm:$0xff] %v563_v42 }
 0x1de   : > { %572 = vst [vmem:[%s224_s26 + $0x10] sm:$0xff] %v564_v43  ;;  %573 = vst [vmem:[%s224_s26 + $0x18] sm:$0xff] %v565_v44 }
 0x1df   : > { %574 = vst [vmem:[%s224_s26 + $0x20] sm:$0xff] %v566_v45  ;;  %575 = vst [vmem:[%s224_s26 + $0x28] sm:$0xff] %v567_v47 }
 0x1e0   : > { %576 = vst [vmem:[%s224_s26 + $0x30] sm:$0xff] %v568_v48  ;;  %577 = vst [vmem:[%s224_s26 + $0x38] sm:$0xff] %v569_v49 }
 0x1e1 PF: > { %s15_s18 = sadd.s32 1, %s743_s18  }
 0x1e2   : > { %p12_p4 = scmp.ge.s32.totalorder %s15_s18, 4  }
 0x1e4   :  { %14 = sbr.rel (!%p12_p4) target bundleno = 1 (0x1), region = 70 }

</bundles_post_ra>
